<compile_context>
chip_gen: v5e
topology: v5e:2x2
jax: 0.10.0
libtpu: 0.0.40
codegen_flags: <defaults>
</compile_context>

<pallas_src>
import functools

import jax
import jax.numpy as jnp
from jax.experimental import pallas as pl
from jax.experimental.pallas import tpu as pltpu

ALPHA = 0.25   # BinaryFocalLoss default alpha
GAMMA = 2.0    # BinaryFocalLoss default gamma (hard-coded as a square below)

LANES = 128


def _iw_focal_partial_kernel(logits_ref, masks_ref, iw_ref, acc_ref, *,
                             n_rows, tile_rows):
    """Accumulates iw * focal_loss elementwise into a (tile_rows, 128) slab."""
    i = pl.program_id(0)

    @pl.when(i == 0)
    def _():
        acc_ref[...] = jnp.zeros_like(acc_ref)

    x = logits_ref[...].astype(jnp.float32)
    t = masks_ref[...].astype(jnp.float32)
    w = iw_ref[...].astype(jnp.float32)

    # Numerically stable BCE-with-logits; share one exp between log1p and
    # sigmoid:  e = exp(-|x|)
    e = jnp.exp(-jnp.abs(x))
    bce = jnp.maximum(x, 0.0) - x * t + jnp.log1p(e)

    denom_inv = 1.0 / (1.0 + e)
    p = jnp.where(x >= 0.0, denom_inv, e * denom_inv)     # == sigmoid(x)

    one_minus_pt = p + t - 2.0 * p * t                    # 1 - p_t
    alpha_t = (1.0 - ALPHA) - (1.0 - 2.0 * ALPHA) * t     # 0.75 - 0.5*t
    loss = alpha_t * (one_minus_pt * one_minus_pt) * bce  # gamma == 2 -> square

    # Mask rows past the end of the real array (tail tile of the cdiv grid).
    row = jax.lax.broadcasted_iota(jnp.int32, x.shape, 0) + i * tile_rows
    contrib = jnp.where(row < n_rows, w * loss, 0.0)

    acc_ref[...] += contrib


@functools.partial(jax.jit, static_argnames=("tile_rows",))
def iw_focal_loss(logits, masks, iw, *, tile_rows=1024):
    """Mean of iw * BinaryFocalLoss(reduction='none')(logits, masks)."""
    assert logits.shape == masks.shape == iw.shape
    n = logits.size

    def flat2d(a):
        a = a.reshape(-1)
        rem = (-a.shape[0]) % LANES
        if rem:
            # Rare path (only when total elements % 128 != 0): pad with zeros.
            # iw padding of 0 nulls the padded elements' contribution.
            a = jnp.concatenate([a, jnp.zeros((rem,), dtype=a.dtype)])
        return a.reshape(-1, LANES)

    # Native dtype all the way into the kernel (kernel upcasts to f32).
    lg = flat2d(logits)
    mk = flat2d(masks)
    ww = flat2d(iw)

    r = lg.shape[0]                           # valid rows
    tr = min(tile_rows, ((r + 7) // 8) * 8)   # block rows (multiple of 8)
    grid = (pl.cdiv(r, tr),)

    blk = pl.BlockSpec((tr, LANES), lambda i: (i, 0))

    partial = pl.pallas_call(
        functools.partial(_iw_focal_partial_kernel, n_rows=r, tile_rows=tr),
        out_shape=jax.ShapeDtypeStruct((tr, LANES), jnp.float32),
        grid_spec=pltpu.PrefetchScalarGridSpec(
            num_scalar_prefetch=0,
            grid=grid,
            in_specs=[blk, blk, blk],
            # Same block every step -> resident VMEM accumulator across grid.
            out_specs=pl.BlockSpec((tr, LANES), lambda i: (0, 0)),
        ),
        compiler_params=pltpu.CompilerParams(
            dimension_semantics=("arbitrary",)),
    )(lg, mk, ww)

    # Final tiny reduction + mean in plain JAX.
    return (jnp.sum(partial) / jnp.float32(n)).astype(jnp.float32)


def _reference(logits, masks, iw):
    x = logits.astype(jnp.float32)
    t = masks.astype(jnp.float32)
    w = iw.astype(jnp.float32)
    bce = jnp.maximum(x, 0.0) - x * t + jnp.log1p(jnp.exp(-jnp.abs(x)))
    p = jax.nn.sigmoid(x)
    p_t = p * t + (1 - p) * (1 - t)
    alpha_t = ALPHA * t + (1 - ALPHA) * (1 - t)
    loss = alpha_t * (1 - p_t) ** 2 * bce
    return jnp.mean(w * loss)


if __name__ == "__main__":
    key = jax.random.PRNGKey(0)
    k1, k2, k3 = jax.random.split(key, 3)

    B, C, H, W = 2, 4, 16, 16   # NCHW, matching the PyTorch convention
    logits = jax.random.normal(k1, (B, C, H, W), dtype=jnp.float32)
    masks = (jax.random.uniform(k2, (B, C, H, W)) > 0.5).astype(jnp.float32)
    iw = jax.random.uniform(k3, (B, C, H, W), dtype=jnp.float32) + 0.5

    out = iw_focal_loss(logits, masks, iw)
    jax.block_until_ready(out)

    ref = _reference(logits, masks, iw)
    assert jnp.allclose(out, ref, rtol=1e-5, atol=1e-6), (out, ref)

    print("KERNEL_OK")
</pallas_src>

<mosaic_0001>
module attributes {stable_mosaic.version = 11 : i64} {
  func.func @_iw_focal_partial_kernel(%arg0: i32, %arg1: memref<16x128xf32, #tpu.memory_space<vmem>>, %arg2: memref<16x128xf32, #tpu.memory_space<vmem>>, %arg3: memref<16x128xf32, #tpu.memory_space<vmem>>, %arg4: memref<16x128xf32, #tpu.memory_space<vmem>>) attributes {dimension_semantics = [#tpu.dimension_semantics<arbitrary>], iteration_bounds = array<i64: 1>, scalar_prefetch = 0 : i64, scratch_operands = 0 : i64, tpu.core_type = #tpu.core_type<tc>, window_params = [{transform_indices = @transform_0, window_bounds = array<i64: 16, 128>}, {transform_indices = @transform_1, window_bounds = array<i64: 16, 128>}, {transform_indices = @transform_2, window_bounds = array<i64: 16, 128>}, {pipeline_mode = #tpu.pipeline_mode<synchronous>, transform_indices = @transform_3, window_bounds = array<i64: 16, 128>}]} {
    %c0_i32 = arith.constant 0 : i32
    %0 = arith.cmpi eq, %arg0, %c0_i32 : i32
    %1 = arith.extui %0 : i1 to i32
    %c0_i32_0 = arith.constant 0 : i32
    %2 = arith.cmpi ne, %1, %c0_i32_0 : i32
    scf.if %2 {
      %cst_19 = arith.constant 0.000000e+00 : f32
      %48 = vector.broadcast %cst_19 : f32 to vector<16x128xf32>
      %c0_20 = arith.constant 0 : index
      %c0_21 = arith.constant 0 : index
      %49 = vector.load %arg4[%c0_20, %c0_21] : memref<16x128xf32, #tpu.memory_space<vmem>>, vector<16x128xf32>
      tpu.vector_store %arg4[%c0_20, %c0_21], %48 {strides = array<i32>} : memref<16x128xf32, #tpu.memory_space<vmem>>, vector<16x128xf32>,
    } else {
    }
    %c0 = arith.constant 0 : index
    %c0_1 = arith.constant 0 : index
    %3 = vector.load %arg1[%c0, %c0_1] : memref<16x128xf32, #tpu.memory_space<vmem>>, vector<16x128xf32>
    %c0_2 = arith.constant 0 : index
    %c0_3 = arith.constant 0 : index
    %4 = vector.load %arg2[%c0_2, %c0_3] : memref<16x128xf32, #tpu.memory_space<vmem>>, vector<16x128xf32>
    %c0_4 = arith.constant 0 : index
    %c0_5 = arith.constant 0 : index
    %5 = vector.load %arg3[%c0_4, %c0_5] : memref<16x128xf32, #tpu.memory_space<vmem>>, vector<16x128xf32>
    %6 = math.absf %3 : vector<16x128xf32>
    %cst = arith.constant 0.000000e+00 : f32
    %7 = vector.broadcast %cst : f32 to vector<16x128xf32>
    %8 = arith.subf %7, %6 : vector<16x128xf32>
    %9 = math.exp %8 : vector<16x128xf32>
    %cst_6 = arith.constant 0.000000e+00 : f32
    %10 = vector.broadcast %cst_6 : f32 to vector<16x128xf32>
    %11 = arith.maximumf %3, %10 : vector<16x128xf32>
    %12 = arith.mulf %3, %4 : vector<16x128xf32>
    %13 = arith.subf %11, %12 : vector<16x128xf32>
    %14 = math.log1p %9 : vector<16x128xf32>
    %15 = arith.addf %13, %14 : vector<16x128xf32>
    %cst_7 = arith.constant 1.000000e+00 : f32
    %16 = vector.broadcast %cst_7 : f32 to vector<16x128xf32>
    %17 = arith.addf %16, %9 : vector<16x128xf32>
    %cst_8 = arith.constant 1.000000e+00 : f32
    %18 = vector.broadcast %cst_8 : f32 to vector<16x128xf32>
    %19 = arith.divf %18, %17 : vector<16x128xf32>
    %cst_9 = arith.constant 0.000000e+00 : f32
    %20 = vector.broadcast %cst_9 : f32 to vector<16x128xf32>
    %21 = arith.cmpf oge, %3, %20 : vector<16x128xf32>
    %22 = arith.mulf %9, %19 : vector<16x128xf32>
    %23 = arith.select %21, %19, %22 : vector<16x128xi1>, vector<16x128xf32>
    %24 = arith.addf %23, %4 : vector<16x128xf32>
    %cst_10 = arith.constant 2.000000e+00 : f32
    %25 = vector.broadcast %cst_10 : f32 to vector<16x128xf32>
    %26 = arith.mulf %25, %23 : vector<16x128xf32>
    %27 = arith.mulf %26, %4 : vector<16x128xf32>
    %28 = arith.subf %24, %27 : vector<16x128xf32>
    %cst_11 = arith.constant 5.000000e-01 : f32
    %29 = vector.broadcast %cst_11 : f32 to vector<16x128xf32>
    %30 = arith.mulf %29, %4 : vector<16x128xf32>
    %cst_12 = arith.constant 7.500000e-01 : f32
    %31 = vector.broadcast %cst_12 : f32 to vector<16x128xf32>
    %32 = arith.subf %31, %30 : vector<16x128xf32>
    %33 = arith.mulf %28, %28 : vector<16x128xf32>
    %34 = arith.mulf %32, %33 : vector<16x128xf32>
    %35 = arith.mulf %34, %15 : vector<16x128xf32>
    %36 = tpu.iota {dimensions = array<i32: 0>} : vector<16x128xi32>
    %c16_i32 = arith.constant 16 : i32
    %37 = arith.muli %arg0, %c16_i32 : i32
    %38 = vector.broadcast %37 : i32 to vector<16x128xi32>
    %39 = arith.addi %36, %38 : vector<16x128xi32>
    %c16_i32_13 = arith.constant 16 : i32
    %40 = vector.broadcast %c16_i32_13 : i32 to vector<16x128xi32>
    %41 = arith.cmpi slt, %39, %40 : vector<16x128xi32>
    %42 = arith.mulf %5, %35 : vector<16x128xf32>
    %cst_14 = arith.constant 0.000000e+00 : f32
    %43 = vector.broadcast %cst_14 : f32 to vector<16x128xf32>
    %44 = arith.select %41, %42, %43 : vector<16x128xi1>, vector<16x128xf32>
    %c0_15 = arith.constant 0 : index
    %c0_16 = arith.constant 0 : index
    %45 = vector.load %arg4[%c0_15, %c0_16] : memref<16x128xf32, #tpu.memory_space<vmem>>, vector<16x128xf32>
    %46 = arith.addf %45, %44 : vector<16x128xf32>
    %c0_17 = arith.constant 0 : index
    %c0_18 = arith.constant 0 : index
    %47 = vector.load %arg4[%c0_17, %c0_18] : memref<16x128xf32, #tpu.memory_space<vmem>>, vector<16x128xf32>
    tpu.vector_store %arg4[%c0_17, %c0_18], %46 {strides = array<i32>} : memref<16x128xf32, #tpu.memory_space<vmem>>, vector<16x128xf32>,
    return
  }
  func.func @transform_0(%arg0: i32) -> (i32, i32) {
    %c0_i32 = arith.constant 0 : i32
    %c0_i32_0 = arith.constant 0 : i32
    return %arg0, %c0_i32 : i32, i32
  }
  func.func @transform_1(%arg0: i32) -> (i32, i32) {
    %c0_i32 = arith.constant 0 : i32
    %c0_i32_0 = arith.constant 0 : i32
    return %arg0, %c0_i32 : i32, i32
  }
  func.func @transform_2(%arg0: i32) -> (i32, i32) {
    %c0_i32 = arith.constant 0 : i32
    %c0_i32_0 = arith.constant 0 : i32
    return %arg0, %c0_i32 : i32, i32
  }
  func.func @transform_3(%arg0: i32) -> (i32, i32) {
    %c0_i32 = arith.constant 0 : i32
    %c0_i32_0 = arith.constant 0 : i32
    %c0_i32_1 = arith.constant 0 : i32
    return %c0_i32, %c0_i32_0 : i32, i32
  }
}

</mosaic_0001>

<bundles_post_ra>
// kernel: iw_focal_loss.1
= control target key start
LH: loop header
LB: loop body
LE: loop exit
PB: predicated region body
PF: predicated region fallthrough
CT: control target
= control target key end

     0   :  { %s237_s0 = inlined_call_operand.vmem [shape: f32[16,128], index: 0, kind: input, shape index: {}]   ;;  %s238_s1 = inlined_call_operand.vmem [shape: f32[16,128], index: 1, kind: input, shape index: {}]   ;;  %s239_s2 = inlined_call_operand.vmem [shape: f32[16,128], index: 2, kind: input, shape index: {}]   ;;  %s240_s3 = inlined_call_operand.vmem [shape: f32[16,128], index: 3, kind: output, shape index: {}]  }
   0x1   :  { %v175_v0 = vld [vmem:[%s237_s0] sm:$0xff]  ;;  %v181_v2 = vld [vmem:[%s237_s0 + $0x8] sm:$0xff] }
   0x2   :  { %v26_v1 = vand.u32 2147483647, %v175_v0  ;;  %v27_v3 = vand.u32 2147483647, %v181_v2  ;;  %v22_v21 = vld [vmem:[%s238_s1] sm:$0xff]  ;;  %v34_v25 = vmax.f32 %v175_v0, 0.0 }
   0x3   :  { %v36_v26 = vmul.f32 %v22_v21, %v175_v0  ;;  %vm92_vm8 = vcmp.ge.f32.partialorder %v175_v0, 0.0  ;;  %vm93_vm9 = vcmp.ge.f32.partialorder %v181_v2, 0.0  ;;  %v106_v45 = vmul.f32 0.5, %v22_v21  ;;  %v23_v52 = vld [vmem:[%s238_s1 + $0x8] sm:$0xff] }
   0x4   :  { %v28_v4 = vsub.f32 0.0, %v26_v1  ;;  %v29_v5 = vsub.f32 0.0, %v27_v3  ;;  %v35_v46 = vmax.f32 %v181_v2, 0.0  ;;  %v37_v57 = vmul.f32 %v23_v52, %v181_v2 }
   0x5   :  { %v38_v38 = vsub.f32 %v34_v25, %v36_v26  ;;  %v107_v61 = vmul.f32 0.5, %v23_v52 }
   0x6   :  { %v30_v6 = vmul.f32 1.442695, %v28_v4  ;;  %v32_v7 = vmul.f32 1.442695, %v29_v5  ;;  %v108_v4 = vsub.f32 0.75, %v106_v45  ;;  %v39_v5 = vsub.f32 %v35_v46, %v37_v57 }
   0x8   :  { %140 = vpow2.f32 %v30_v6 }
   0x9   :  { %142 = vpow2.f32 %v32_v7 }
   0xe   :  { %v141_v8 = vpop.eup %140 }
   0xf   :  { %v184_v9 = vpop.eup %142  ;;  %v40_v10 = vadd.f32 1.0, %v141_v8  ;;  %v43_v19 = vmul.f32 -0.5, %v141_v8  ;;  %v46_v39 = vand.u32 2147483647, %v141_v8 }
  0x10   :  { %v49_v11 = vadd.f32 1.0, %v184_v9  ;;  %v52_v30 = vmul.f32 -0.5, %v184_v9  ;;  %v55_v47 = vand.u32 2147483647, %v184_v9 }
  0x11   :  { %144 = vrcp.f32 %v40_v10  ;;  %vm67_vm0 = vweird.f32 %v40_v10  ;;  %v73_v15 = vand.u32 2147483648, %v40_v10  ;;  %v71_v17 = vand.u32 2147483647, %v40_v10 }
  0x12   :  { %146 = vrcp.f32 %v49_v11  ;;  %vm82_vm2 = vweird.f32 %v49_v11  ;;  %v88_v20 = vand.u32 2147483648, %v49_v11  ;;  %v86_v24 = vand.u32 2147483647, %v49_v11 }
  0x13   :  { %148 = vlog2.f32 %v40_v10  ;;  %v74_v28 = vor.u32 1.1754944e-38, %v73_v15  ;;  %vm72_vm5 = vcmp.eq.f32.partialorder %v71_v17, 8.507059e+37  ;;  %v44_v34 = vadd.f32 1.0, %v43_v19  ;;  %v25_v17 = vld [vmem:[%s239_s2 + $0x8] sm:$0xff] }
  0x14   :  { %150 = vlog2.f32 %v49_v11  ;;  %v89_v33 = vor.u32 1.1754944e-38, %v88_v20  ;;  %vm87_vm7 = vcmp.eq.f32.partialorder %v86_v24, 8.507059e+37  ;;  %v53_v42 = vadd.f32 1.0, %v52_v30 }
  0x15   :  { %v45_v50 = vmul.f32 %v141_v8, %v44_v34  ;;  %vm215_vm10 = vcmp.lt.f32.partialorder %v46_v39, 0.0004427343  ;;  %vm56_vm11 = vcmp.lt.f32.partialorder %v55_v47, 0.0004427343 }
  0x16   :  { %v54_v59 = vmul.f32 %v184_v9, %v53_v42 }
  0x17   :  { %v145_v12 = vpop.eup %144 }
  0x18   :  { %v63_v13 = vmul.f32 %v145_v12, %v40_v10  ;;  %v147_v14 = vpop.eup %146  ;;  %vm68_vm1 = vweird.f32 %v145_v12 }
  0x19   :  { %v78_v18 = vmul.f32 %v147_v14, %v49_v11  ;;  %vm83_vm3 = vweird.f32 %v147_v14  ;;  %vm193_vm4 = vmor %vm67_vm0, %vm68_vm1  ;;  %v149_v37 = vpop.eup %148 }
  0x1a   :  { %v64_v16 = vsub.f32 1.0, %v63_v13  ;;  %vm199_vm6 = vmor %vm82_vm2, %vm83_vm3  ;;  %v151_v44 = vpop.eup %150  ;;  %v42_v49 = vmul.f32 0.6931472, %v149_v37 }
  0x1b   :  { %v79_v23 = vsub.f32 1.0, %v78_v18  ;;  %v51_v58 = vmul.f32 0.6931472, %v151_v44 }
  0x1c   :  { %v65_v22 = vmul.f32 %v145_v12, %v64_v16  ;;  %v48_v1 = vsel %vm215_vm10, %v45_v50, %v42_v49 }
  0x1d   :  { %v80_v31 = vmul.f32 %v147_v14, %v79_v23  ;;  %v57_v7 = vsel %vm56_vm11, %v54_v59, %v51_v58 }
  0x1e   :  { %v66_v29 = vadd.f32 %v145_v12, %v65_v22  ;;  %v59_v2 = vadd.f32 %v57_v7, %v39_v5 }
  0x1f   :  { %v81_v36 = vadd.f32 %v147_v14, %v80_v31 }
  0x20   :  { %v70_v35 = vsel %vm193_vm4, %v145_v12, %v66_v29 }
  0x21   :  { %v75_v40 = vsel %vm72_vm5, %v74_v28, %v70_v35  ;;  %v85_v43 = vsel %vm199_vm6, %v147_v14, %v81_v36  ;;  %v24_v14 = vld [vmem:[%s239_s2] sm:$0xff] }
  0x22   :  { %v94_v41 = vmul.f32 %v141_v8, %v75_v40  ;;  %v90_v48 = vsel %vm87_vm7, %v89_v33, %v85_v43  ;;  %v58_v8 = vadd.f32 %v48_v1, %v38_v38 }
  0x23   :  { %v95_v53 = vmul.f32 %v184_v9, %v90_v48  ;;  %v109_v9 = vsub.f32 0.75, %v107_v61 }
  0x24   :  { %v96_v51 = vsel %vm92_vm8, %v75_v40, %v94_v41 }
  0x25   :  { %v98_v55 = vadd.f32 %v96_v51, %v22_v21  ;;  %v100_v56 = vmul.f32 2.0, %v96_v51  ;;  %v97_v60 = vsel %vm93_vm9, %v90_v48, %v95_v53 }
  0x26   :  { %v99_v63 = vadd.f32 %v97_v60, %v23_v52  ;;  %v101_v0 = vmul.f32 2.0, %v97_v60 }
  0x27   :  { %v102_v62 = vmul.f32 %v100_v56, %v22_v21 }
  0x28   :  { %v103_v6 = vmul.f32 %v101_v0, %v23_v52 }
  0x29   :  { %v104_v3 = vsub.f32 %v98_v55, %v102_v62 }
  0x2a   :  { %v105_v11 = vsub.f32 %v99_v63, %v103_v6 }
  0x2b   :  { %v110_v10 = vmul.f32 %v104_v3, %v104_v3 }
  0x2c   :  { %v111_v13 = vmul.f32 %v105_v11, %v105_v11 }
  0x2d   :  { %v112_v12 = vmul.f32 %v110_v10, %v108_v4 }
  0x2e   :  { %v113_v16 = vmul.f32 %v111_v13, %v109_v9 }
  0x2f   :  { %v114_v15 = vmul.f32 %v112_v12, %v58_v8 }
  0x30   :  { %v115_v19 = vmul.f32 %v113_v16, %v59_v2 }
  0x31   :  { %v125_v18 = vmul.f32 %v114_v15, %v24_v14 }
  0x32   :  { %v126_v20 = vmul.f32 %v115_v19, %v25_v17 }
  0x33   :  { %133 = vst [vmem:[%s240_s3] sm:$0xff] %v125_v18 }
  0x34   :  { %134 = vst [vmem:[%s240_s3 + $0x8] sm:$0xff] %v126_v20 }

</bundles_post_ra>
